<compile_context>
chip_gen: v7x
topology: tpu7x:2x2x1
jax: 0.10.0
libtpu: 0.0.40
codegen_flags: <defaults>
</compile_context>

<pallas_src>
import functools

import jax
import jax.numpy as jnp
from jax.experimental import pallas as pl
from jax.experimental.pallas import tpu as pltpu


def _round_up(x, m):
    return ((x + m - 1) // m) * m


def avgpool_att_kernel(x_ref, w1_ref, b1_ref, w2_ref, b2_ref, out_ref, acc_ref,
                       *, inv_l, hidden):
    # x_ref  : (BT, LT, C) f32 VMEM   -- C on the lane axis
    # w1/b1/w2_ref : (H,) f32 SMEM ; b2_ref : (1,) f32 SMEM
    # out_ref: (BT, C) f32 VMEM       -- lane/sublane-dense store
    # acc_ref: (BT, C) f32 VMEM scratch -- running sum across the L grid axis
    l_idx = pl.program_id(1)

    @pl.when(l_idx == 0)
    def _init():
        acc_ref[...] = jnp.zeros_like(acc_ref)

    # Partial sum over this L tile (sublane reduction; result stays C-on-lanes).
    acc_ref[...] += jnp.sum(x_ref[...], axis=1)

    @pl.when(l_idx == pl.num_programs(1) - 1)
    def _finalize():
        m = acc_ref[...] * inv_l                      # (BT, C) mean over original L
        # 1x1 Conv2d(1->16) + Tanh + 1x1 Conv2d(16->1), unrolled over H=16.
        # Params are SMEM scalars, so every vector op is a (BT, C) lane-dense tile.
        z = jnp.zeros_like(m)
        for h in range(hidden):
            z = z + w2_ref[h] * jnp.tanh(w1_ref[h] * m + b1_ref[h])
        z = z + b2_ref[0]
        # Softmax over the feature axis (C, on lanes).
        z = z - jnp.max(z, axis=-1, keepdims=True)
        e = jnp.exp(z)
        denom = jnp.sum(e, axis=-1, keepdims=True)
        out_ref[...] = e * pl.reciprocal(denom, approx=True)


def avgpool_att_1d(feature, w1, b1, w2, b2):
    """feature: (B, C, L) f32 (PyTorch NCL). Conv params as flat 1-D arrays.

    Returns att of shape (B, 1, C), matching the PyTorch module output.
    """
    B, C, L = feature.shape
    w1 = w1.reshape(-1).astype(jnp.float32)
    b1 = b1.reshape(-1).astype(jnp.float32)
    w2 = w2.reshape(-1).astype(jnp.float32)
    b2 = b2.reshape(-1).astype(jnp.float32)
    H = int(w1.shape[0])

    # Put C on the lane axis end-to-end: (B, C, L) -> (B, L, C).
    x = jnp.transpose(feature.astype(jnp.float32), (0, 2, 1))

    # ---- tile sizing (generation-aware, conservative) -----------------------
    # Batch tile: sublane-dense (multiple of 8), big enough to amortize the
    # ~0.35us/step pipeline overhead.  L tile: keep each pipelined input buffer
    # <= ~4 MiB so 2x double-buffering + output + scratch stays well inside
    # v7x's 32 MiB scoped-VMEM default (v5e: 16 MiB, v6e: 32 MiB).
    per_buf_budget = 4 * 1024 * 1024
    bt = min(_round_up(B, 8), 256)
    pb = _round_up(B, bt)
    if bt * L * C * 4 <= per_buf_budget:
        lt, pad_l = L, L                              # whole L per step
    else:
        lt = max(8, (per_buf_budget // (bt * C * 4)) // 8 * 8)
        pad_l = _round_up(L, lt)

    if (pb, pad_l) != (B, L):
        # Zero padding is exact for the running sum; the mean divides by the
        # *original* L (compile-time constant).  Padded batch rows produce a
        # harmless uniform softmax and are sliced off below.
        x = jnp.pad(x, ((0, pb - B), (0, pad_l - L), (0, 0)))

    grid = (pb // bt, pad_l // lt)

    kernel = functools.partial(avgpool_att_kernel, inv_l=1.0 / L, hidden=H)

    out = pl.pallas_call(
        kernel,
        out_shape=jax.ShapeDtypeStruct((pb, C), jnp.float32),
        grid_spec=pltpu.PrefetchScalarGridSpec(
            num_scalar_prefetch=0,
            grid=grid,
            in_specs=[
                pl.BlockSpec((bt, lt, C), lambda b, l: (b, l, 0)),
                pl.BlockSpec(memory_space=pltpu.MemorySpace.SMEM),  # w1 (H,)
                pl.BlockSpec(memory_space=pltpu.MemorySpace.SMEM),  # b1 (H,)
                pl.BlockSpec(memory_space=pltpu.MemorySpace.SMEM),  # w2 (H,)
                pl.BlockSpec(memory_space=pltpu.MemorySpace.SMEM),  # b2 (1,)
            ],
            out_specs=pl.BlockSpec((bt, C), lambda b, l: (b, 0)),
            scratch_shapes=[pltpu.VMEM((bt, C), jnp.float32)],
        ),
        compiler_params=pltpu.CompilerParams(
            dimension_semantics=("parallel", "arbitrary")),
    )(x, w1, b1, w2, b2)

    return out[:B, None, :]                           # (B, 1, C)


def avgpool_att_1d_ref(feature, w1, b1, w2, b2):
    """Pure-JAX reference mirroring the PyTorch module (random_att=False)."""
    m = jnp.mean(feature, axis=-1)                                     # (B, C)
    h = jnp.tanh(m[:, None, :] * w1[:, None] + b1[:, None])            # (B, H, C)
    z = jnp.sum(h * w2[:, None], axis=1) + b2[0]                       # (B, C)
    return jax.nn.softmax(z, axis=-1)[:, None, :]                      # (B, 1, C)


if __name__ == "__main__":
    B, C, L, H = 2, 8, 16, 16   # batch, num_feature, seq length; conv hidden fixed at 16

    key = jax.random.PRNGKey(0)
    kx, k1, k2, k3, k4 = jax.random.split(key, 5)

    # Conv2d(1,16,1) / Conv2d(16,1,1) collapse to per-hidden-channel scalars.
    w1 = 0.5 * jax.random.normal(k1, (H,), jnp.float32)   # conv1.weight (16,1,1,1) flattened
    b1 = 0.1 * jax.random.normal(k2, (H,), jnp.float32)   # conv1.bias   (16,)
    w2 = 0.5 * jax.random.normal(k3, (H,), jnp.float32)   # conv2.weight (1,16,1,1) flattened
    b2 = 0.1 * jax.random.normal(k4, (1,), jnp.float32)   # conv2.bias   (1,)

    x = jax.random.normal(kx, (B, C, L), jnp.float32)

    att = jax.block_until_ready(avgpool_att_1d(x, w1, b1, w2, b2))
    att_ref = avgpool_att_1d_ref(x, w1, b1, w2, b2)

    assert att.shape == (B, 1, C), att.shape
    # pl.reciprocal(approx=True) in the softmax -> ~1e-3-level tolerance.
    assert jnp.allclose(att, att_ref, atol=5e-3, rtol=5e-3), (att, att_ref)
    assert jnp.allclose(jnp.sum(att, axis=-1), 1.0, atol=5e-3)

    print("KERNEL_OK")
</pallas_src>

<mosaic_0001>
module attributes {stable_mosaic.version = 11 : i64} {
  func.func @avgpool_att_kernel(%arg0: i32, %arg1: i32, %arg2: memref<8x16x8xf32, #tpu.memory_space<vmem>>, %arg3: memref<16xf32, #tpu.memory_space<smem>>, %arg4: memref<16xf32, #tpu.memory_space<smem>>, %arg5: memref<16xf32, #tpu.memory_space<smem>>, %arg6: memref<1xf32, #tpu.memory_space<smem>>, %arg7: memref<8x8xf32, #tpu.memory_space<vmem>>, %arg8: memref<8x8xf32, #tpu.memory_space<vmem>>) attributes {dimension_semantics = [#tpu.dimension_semantics<parallel>, #tpu.dimension_semantics<arbitrary>], iteration_bounds = array<i64: 1, 1>, scalar_prefetch = 0 : i64, scratch_operands = 1 : i64, tpu.core_type = #tpu.core_type<tc>, window_params = [{transform_indices = @transform_0, window_bounds = array<i64: 8, 16, 8>}, {transform_indices = @transform_1, window_bounds = array<i64: 16>}, {transform_indices = @transform_2, window_bounds = array<i64: 16>}, {transform_indices = @transform_3, window_bounds = array<i64: 16>}, {transform_indices = @transform_4, window_bounds = array<i64: 1>}, {transform_indices = @transform_5, window_bounds = array<i64: 8, 8>}]} {
    %c0_i32 = arith.constant 0 : i32
    %0 = arith.cmpi eq, %arg1, %c0_i32 : i32
    %1 = arith.extui %0 : i1 to i32
    %c0_i32_0 = arith.constant 0 : i32
    %2 = arith.cmpi ne, %1, %c0_i32_0 : i32
    scf.if %2 {
      %cst_9 = arith.constant 0.000000e+00 : f32
      %11 = vector.broadcast %cst_9 : f32 to vector<8x8xf32>
      %c0_10 = arith.constant 0 : index
      %c0_11 = arith.constant 0 : index
      %12 = vector.load %arg8[%c0_10, %c0_11] : memref<8x8xf32, #tpu.memory_space<vmem>>, vector<8x8xf32>
      tpu.vector_store %arg8[%c0_10, %c0_11], %11 {strides = array<i32>} : memref<8x8xf32, #tpu.memory_space<vmem>>, vector<8x8xf32>,
    } else {
    }
    %c0 = arith.constant 0 : index
    %c0_1 = arith.constant 0 : index
    %3 = vector.load %arg8[%c0, %c0_1] : memref<8x8xf32, #tpu.memory_space<vmem>>, vector<8x8xf32>
    %c0_2 = arith.constant 0 : index
    %c0_3 = arith.constant 0 : index
    %c0_4 = arith.constant 0 : index
    %4 = vector.load %arg2[%c0_2, %c0_3, %c0_4] : memref<8x16x8xf32, #tpu.memory_space<vmem>>, vector<8x16x8xf32>
    %cst = arith.constant dense<0.000000e+00> : vector<8x8xf32>
    %5 = vector.multi_reduction <add>, %4, %cst [1] : vector<8x16x8xf32> to vector<8x8xf32>
    %6 = arith.addf %3, %5 : vector<8x8xf32>
    %c0_5 = arith.constant 0 : index
    %c0_6 = arith.constant 0 : index
    %7 = vector.load %arg8[%c0_5, %c0_6] : memref<8x8xf32, #tpu.memory_space<vmem>>, vector<8x8xf32>
    tpu.vector_store %arg8[%c0_5, %c0_6], %6 {strides = array<i32>} : memref<8x8xf32, #tpu.memory_space<vmem>>, vector<8x8xf32>,
    %c0_i32_7 = arith.constant 0 : i32
    %8 = arith.cmpi eq, %arg1, %c0_i32_7 : i32
    %9 = arith.extui %8 : i1 to i32
    %c0_i32_8 = arith.constant 0 : i32
    %10 = arith.cmpi ne, %9, %c0_i32_8 : i32
    scf.if %10 {
      %c0_9 = arith.constant 0 : index
      %c0_10 = arith.constant 0 : index
      %11 = vector.load %arg8[%c0_9, %c0_10] : memref<8x8xf32, #tpu.memory_space<vmem>>, vector<8x8xf32>
      %cst_11 = arith.constant 6.250000e-02 : f32
      %12 = vector.broadcast %cst_11 : f32 to vector<8x8xf32>
      %13 = arith.mulf %11, %12 : vector<8x8xf32>
      %cst_12 = arith.constant 0.000000e+00 : f32
      %14 = vector.broadcast %cst_12 : f32 to vector<8x8xf32>
      %c0_13 = arith.constant 0 : index
      %15 = memref.load %arg5[%c0_13] : memref<16xf32, #tpu.memory_space<smem>>
      %c0_14 = arith.constant 0 : index
      %16 = memref.load %arg3[%c0_14] : memref<16xf32, #tpu.memory_space<smem>>
      %17 = vector.broadcast %16 : f32 to vector<8x8xf32>
      %18 = arith.mulf %17, %13 : vector<8x8xf32>
      %c0_15 = arith.constant 0 : index
      %19 = memref.load %arg4[%c0_15] : memref<16xf32, #tpu.memory_space<smem>>
      %20 = vector.broadcast %19 : f32 to vector<8x8xf32>
      %21 = arith.addf %18, %20 : vector<8x8xf32>
      %22 = math.tanh %21 : vector<8x8xf32>
      %23 = vector.broadcast %15 : f32 to vector<8x8xf32>
      %24 = arith.mulf %23, %22 : vector<8x8xf32>
      %25 = arith.addf %14, %24 : vector<8x8xf32>
      %c1 = arith.constant 1 : index
      %26 = memref.load %arg5[%c1] : memref<16xf32, #tpu.memory_space<smem>>
      %c1_16 = arith.constant 1 : index
      %27 = memref.load %arg3[%c1_16] : memref<16xf32, #tpu.memory_space<smem>>
      %28 = vector.broadcast %27 : f32 to vector<8x8xf32>
      %29 = arith.mulf %28, %13 : vector<8x8xf32>
      %c1_17 = arith.constant 1 : index
      %30 = memref.load %arg4[%c1_17] : memref<16xf32, #tpu.memory_space<smem>>
      %31 = vector.broadcast %30 : f32 to vector<8x8xf32>
      %32 = arith.addf %29, %31 : vector<8x8xf32>
      %33 = math.tanh %32 : vector<8x8xf32>
      %34 = vector.broadcast %26 : f32 to vector<8x8xf32>
      %35 = arith.mulf %34, %33 : vector<8x8xf32>
      %36 = arith.addf %25, %35 : vector<8x8xf32>
      %c2 = arith.constant 2 : index
      %37 = memref.load %arg5[%c2] : memref<16xf32, #tpu.memory_space<smem>>
      %c2_18 = arith.constant 2 : index
      %38 = memref.load %arg3[%c2_18] : memref<16xf32, #tpu.memory_space<smem>>
      %39 = vector.broadcast %38 : f32 to vector<8x8xf32>
      %40 = arith.mulf %39, %13 : vector<8x8xf32>
      %c2_19 = arith.constant 2 : index
      %41 = memref.load %arg4[%c2_19] : memref<16xf32, #tpu.memory_space<smem>>
      %42 = vector.broadcast %41 : f32 to vector<8x8xf32>
      %43 = arith.addf %40, %42 : vector<8x8xf32>
      %44 = math.tanh %43 : vector<8x8xf32>
      %45 = vector.broadcast %37 : f32 to vector<8x8xf32>
      %46 = arith.mulf %45, %44 : vector<8x8xf32>
      %47 = arith.addf %36, %46 : vector<8x8xf32>
      %c3 = arith.constant 3 : index
      %48 = memref.load %arg5[%c3] : memref<16xf32, #tpu.memory_space<smem>>
      %c3_20 = arith.constant 3 : index
      %49 = memref.load %arg3[%c3_20] : memref<16xf32, #tpu.memory_space<smem>>
      %50 = vector.broadcast %49 : f32 to vector<8x8xf32>
      %51 = arith.mulf %50, %13 : vector<8x8xf32>
      %c3_21 = arith.constant 3 : index
      %52 = memref.load %arg4[%c3_21] : memref<16xf32, #tpu.memory_space<smem>>
      %53 = vector.broadcast %52 : f32 to vector<8x8xf32>
      %54 = arith.addf %51, %53 : vector<8x8xf32>
      %55 = math.tanh %54 : vector<8x8xf32>
      %56 = vector.broadcast %48 : f32 to vector<8x8xf32>
      %57 = arith.mulf %56, %55 : vector<8x8xf32>
      %58 = arith.addf %47, %57 : vector<8x8xf32>
      %c4 = arith.constant 4 : index
      %59 = memref.load %arg5[%c4] : memref<16xf32, #tpu.memory_space<smem>>
      %c4_22 = arith.constant 4 : index
      %60 = memref.load %arg3[%c4_22] : memref<16xf32, #tpu.memory_space<smem>>
      %61 = vector.broadcast %60 : f32 to vector<8x8xf32>
      %62 = arith.mulf %61, %13 : vector<8x8xf32>
      %c4_23 = arith.constant 4 : index
      %63 = memref.load %arg4[%c4_23] : memref<16xf32, #tpu.memory_space<smem>>
      %64 = vector.broadcast %63 : f32 to vector<8x8xf32>
      %65 = arith.addf %62, %64 : vector<8x8xf32>
      %66 = math.tanh %65 : vector<8x8xf32>
      %67 = vector.broadcast %59 : f32 to vector<8x8xf32>
      %68 = arith.mulf %67, %66 : vector<8x8xf32>
      %69 = arith.addf %58, %68 : vector<8x8xf32>
      %c5 = arith.constant 5 : index
      %70 = memref.load %arg5[%c5] : memref<16xf32, #tpu.memory_space<smem>>
      %c5_24 = arith.constant 5 : index
      %71 = memref.load %arg3[%c5_24] : memref<16xf32, #tpu.memory_space<smem>>
      %72 = vector.broadcast %71 : f32 to vector<8x8xf32>
      %73 = arith.mulf %72, %13 : vector<8x8xf32>
      %c5_25 = arith.constant 5 : index
      %74 = memref.load %arg4[%c5_25] : memref<16xf32, #tpu.memory_space<smem>>
      %75 = vector.broadcast %74 : f32 to vector<8x8xf32>
      %76 = arith.addf %73, %75 : vector<8x8xf32>
      %77 = math.tanh %76 : vector<8x8xf32>
      %78 = vector.broadcast %70 : f32 to vector<8x8xf32>
      %79 = arith.mulf %78, %77 : vector<8x8xf32>
      %80 = arith.addf %69, %79 : vector<8x8xf32>
      %c6 = arith.constant 6 : index
      %81 = memref.load %arg5[%c6] : memref<16xf32, #tpu.memory_space<smem>>
      %c6_26 = arith.constant 6 : index
      %82 = memref.load %arg3[%c6_26] : memref<16xf32, #tpu.memory_space<smem>>
      %83 = vector.broadcast %82 : f32 to vector<8x8xf32>
      %84 = arith.mulf %83, %13 : vector<8x8xf32>
      %c6_27 = arith.constant 6 : index
      %85 = memref.load %arg4[%c6_27] : memref<16xf32, #tpu.memory_space<smem>>
      %86 = vector.broadcast %85 : f32 to vector<8x8xf32>
      %87 = arith.addf %84, %86 : vector<8x8xf32>
      %88 = math.tanh %87 : vector<8x8xf32>
      %89 = vector.broadcast %81 : f32 to vector<8x8xf32>
      %90 = arith.mulf %89, %88 : vector<8x8xf32>
      %91 = arith.addf %80, %90 : vector<8x8xf32>
      %c7 = arith.constant 7 : index
      %92 = memref.load %arg5[%c7] : memref<16xf32, #tpu.memory_space<smem>>
      %c7_28 = arith.constant 7 : index
      %93 = memref.load %arg3[%c7_28] : memref<16xf32, #tpu.memory_space<smem>>
      %94 = vector.broadcast %93 : f32 to vector<8x8xf32>
      %95 = arith.mulf %94, %13 : vector<8x8xf32>
      %c7_29 = arith.constant 7 : index
      %96 = memref.load %arg4[%c7_29] : memref<16xf32, #tpu.memory_space<smem>>
      %97 = vector.broadcast %96 : f32 to vector<8x8xf32>
      %98 = arith.addf %95, %97 : vector<8x8xf32>
      %99 = math.tanh %98 : vector<8x8xf32>
      %100 = vector.broadcast %92 : f32 to vector<8x8xf32>
      %101 = arith.mulf %100, %99 : vector<8x8xf32>
      %102 = arith.addf %91, %101 : vector<8x8xf32>
      %c8 = arith.constant 8 : index
      %103 = memref.load %arg5[%c8] : memref<16xf32, #tpu.memory_space<smem>>
      %c8_30 = arith.constant 8 : index
      %104 = memref.load %arg3[%c8_30] : memref<16xf32, #tpu.memory_space<smem>>
      %105 = vector.broadcast %104 : f32 to vector<8x8xf32>
      %106 = arith.mulf %105, %13 : vector<8x8xf32>
      %c8_31 = arith.constant 8 : index
      %107 = memref.load %arg4[%c8_31] : memref<16xf32, #tpu.memory_space<smem>>
      %108 = vector.broadcast %107 : f32 to vector<8x8xf32>
      %109 = arith.addf %106, %108 : vector<8x8xf32>
      %110 = math.tanh %109 : vector<8x8xf32>
      %111 = vector.broadcast %103 : f32 to vector<8x8xf32>
      %112 = arith.mulf %111, %110 : vector<8x8xf32>
      %113 = arith.addf %102, %112 : vector<8x8xf32>
      %c9 = arith.constant 9 : index
      %114 = memref.load %arg5[%c9] : memref<16xf32, #tpu.memory_space<smem>>
      %c9_32 = arith.constant 9 : index
      %115 = memref.load %arg3[%c9_32] : memref<16xf32, #tpu.memory_space<smem>>
      %116 = vector.broadcast %115 : f32 to vector<8x8xf32>
      %117 = arith.mulf %116, %13 : vector<8x8xf32>
      %c9_33 = arith.constant 9 : index
      %118 = memref.load %arg4[%c9_33] : memref<16xf32, #tpu.memory_space<smem>>
      %119 = vector.broadcast %118 : f32 to vector<8x8xf32>
      %120 = arith.addf %117, %119 : vector<8x8xf32>
      %121 = math.tanh %120 : vector<8x8xf32>
      %122 = vector.broadcast %114 : f32 to vector<8x8xf32>
      %123 = arith.mulf %122, %121 : vector<8x8xf32>
      %124 = arith.addf %113, %123 : vector<8x8xf32>
      %c10 = arith.constant 10 : index
      %125 = memref.load %arg5[%c10] : memref<16xf32, #tpu.memory_space<smem>>
      %c10_34 = arith.constant 10 : index
      %126 = memref.load %arg3[%c10_34] : memref<16xf32, #tpu.memory_space<smem>>
      %127 = vector.broadcast %126 : f32 to vector<8x8xf32>
      %128 = arith.mulf %127, %13 : vector<8x8xf32>
      %c10_35 = arith.constant 10 : index
      %129 = memref.load %arg4[%c10_35] : memref<16xf32, #tpu.memory_space<smem>>
      %130 = vector.broadcast %129 : f32 to vector<8x8xf32>
      %131 = arith.addf %128, %130 : vector<8x8xf32>
      %132 = math.tanh %131 : vector<8x8xf32>
      %133 = vector.broadcast %125 : f32 to vector<8x8xf32>
      %134 = arith.mulf %133, %132 : vector<8x8xf32>
      %135 = arith.addf %124, %134 : vector<8x8xf32>
      %c11 = arith.constant 11 : index
      %136 = memref.load %arg5[%c11] : memref<16xf32, #tpu.memory_space<smem>>
      %c11_36 = arith.constant 11 : index
      %137 = memref.load %arg3[%c11_36] : memref<16xf32, #tpu.memory_space<smem>>
      %138 = vector.broadcast %137 : f32 to vector<8x8xf32>
      %139 = arith.mulf %138, %13 : vector<8x8xf32>
      %c11_37 = arith.constant 11 : index
      %140 = memref.load %arg4[%c11_37] : memref<16xf32, #tpu.memory_space<smem>>
      %141 = vector.broadcast %140 : f32 to vector<8x8xf32>
      %142 = arith.addf %139, %141 : vector<8x8xf32>
      %143 = math.tanh %142 : vector<8x8xf32>
      %144 = vector.broadcast %136 : f32 to vector<8x8xf32>
      %145 = arith.mulf %144, %143 : vector<8x8xf32>
      %146 = arith.addf %135, %145 : vector<8x8xf32>
      %c12 = arith.constant 12 : index
      %147 = memref.load %arg5[%c12] : memref<16xf32, #tpu.memory_space<smem>>
      %c12_38 = arith.constant 12 : index
      %148 = memref.load %arg3[%c12_38] : memref<16xf32, #tpu.memory_space<smem>>
      %149 = vector.broadcast %148 : f32 to vector<8x8xf32>
      %150 = arith.mulf %149, %13 : vector<8x8xf32>
      %c12_39 = arith.constant 12 : index
      %151 = memref.load %arg4[%c12_39] : memref<16xf32, #tpu.memory_space<smem>>
      %152 = vector.broadcast %151 : f32 to vector<8x8xf32>
      %153 = arith.addf %150, %152 : vector<8x8xf32>
      %154 = math.tanh %153 : vector<8x8xf32>
      %155 = vector.broadcast %147 : f32 to vector<8x8xf32>
      %156 = arith.mulf %155, %154 : vector<8x8xf32>
      %157 = arith.addf %146, %156 : vector<8x8xf32>
      %c13 = arith.constant 13 : index
      %158 = memref.load %arg5[%c13] : memref<16xf32, #tpu.memory_space<smem>>
      %c13_40 = arith.constant 13 : index
      %159 = memref.load %arg3[%c13_40] : memref<16xf32, #tpu.memory_space<smem>>
      %160 = vector.broadcast %159 : f32 to vector<8x8xf32>
      %161 = arith.mulf %160, %13 : vector<8x8xf32>
      %c13_41 = arith.constant 13 : index
      %162 = memref.load %arg4[%c13_41] : memref<16xf32, #tpu.memory_space<smem>>
      %163 = vector.broadcast %162 : f32 to vector<8x8xf32>
      %164 = arith.addf %161, %163 : vector<8x8xf32>
      %165 = math.tanh %164 : vector<8x8xf32>
      %166 = vector.broadcast %158 : f32 to vector<8x8xf32>
      %167 = arith.mulf %166, %165 : vector<8x8xf32>
      %168 = arith.addf %157, %167 : vector<8x8xf32>
      %c14 = arith.constant 14 : index
      %169 = memref.load %arg5[%c14] : memref<16xf32, #tpu.memory_space<smem>>
      %c14_42 = arith.constant 14 : index
      %170 = memref.load %arg3[%c14_42] : memref<16xf32, #tpu.memory_space<smem>>
      %171 = vector.broadcast %170 : f32 to vector<8x8xf32>
      %172 = arith.mulf %171, %13 : vector<8x8xf32>
      %c14_43 = arith.constant 14 : index
      %173 = memref.load %arg4[%c14_43] : memref<16xf32, #tpu.memory_space<smem>>
      %174 = vector.broadcast %173 : f32 to vector<8x8xf32>
      %175 = arith.addf %172, %174 : vector<8x8xf32>
      %176 = math.tanh %175 : vector<8x8xf32>
      %177 = vector.broadcast %169 : f32 to vector<8x8xf32>
      %178 = arith.mulf %177, %176 : vector<8x8xf32>
      %179 = arith.addf %168, %178 : vector<8x8xf32>
      %c15 = arith.constant 15 : index
      %180 = memref.load %arg5[%c15] : memref<16xf32, #tpu.memory_space<smem>>
      %c15_44 = arith.constant 15 : index
      %181 = memref.load %arg3[%c15_44] : memref<16xf32, #tpu.memory_space<smem>>
      %182 = vector.broadcast %181 : f32 to vector<8x8xf32>
      %183 = arith.mulf %182, %13 : vector<8x8xf32>
      %c15_45 = arith.constant 15 : index
      %184 = memref.load %arg4[%c15_45] : memref<16xf32, #tpu.memory_space<smem>>
      %185 = vector.broadcast %184 : f32 to vector<8x8xf32>
      %186 = arith.addf %183, %185 : vector<8x8xf32>
      %187 = math.tanh %186 : vector<8x8xf32>
      %188 = vector.broadcast %180 : f32 to vector<8x8xf32>
      %189 = arith.mulf %188, %187 : vector<8x8xf32>
      %190 = arith.addf %179, %189 : vector<8x8xf32>
      %c0_46 = arith.constant 0 : index
      %191 = memref.load %arg6[%c0_46] : memref<1xf32, #tpu.memory_space<smem>>
      %192 = vector.broadcast %191 : f32 to vector<8x8xf32>
      %193 = arith.addf %190, %192 : vector<8x8xf32>
      %cst_47 = arith.constant dense<0xFF800000> : vector<8xf32>
      %194 = vector.multi_reduction <maximumf>, %193, %cst_47 [1] : vector<8x8xf32> to vector<8xf32>
      %195 = vector.shape_cast %194 : vector<8xf32> to vector<8x1xf32>
      %196 = vector.broadcast %195 : vector<8x1xf32> to vector<8x8xf32>
      %197 = arith.subf %193, %196 : vector<8x8xf32>
      %198 = math.exp %197 : vector<8x8xf32>
      %cst_48 = arith.constant dense<0.000000e+00> : vector<8xf32>
      %199 = vector.multi_reduction <add>, %198, %cst_48 [1] : vector<8x8xf32> to vector<8xf32>
      %200 = vector.shape_cast %199 : vector<8xf32> to vector<8x1xf32>
      %201 = tpu.reciprocal %200 {approx = true} : vector<8x1xf32> -> vector<8x1xf32>
      %202 = vector.broadcast %201 : vector<8x1xf32> to vector<8x8xf32>
      %203 = arith.mulf %198, %202 : vector<8x8xf32>
      %c0_49 = arith.constant 0 : index
      %c0_50 = arith.constant 0 : index
      %204 = vector.load %arg7[%c0_49, %c0_50] : memref<8x8xf32, #tpu.memory_space<vmem>>, vector<8x8xf32>
      tpu.vector_store %arg7[%c0_49, %c0_50], %203 {strides = array<i32>} : memref<8x8xf32, #tpu.memory_space<vmem>>, vector<8x8xf32>,
    } else {
    }
    return
  }
  func.func @transform_0(%arg0: i32, %arg1: i32) -> (i32, i32, i32) {
    %c0_i32 = arith.constant 0 : i32
    %c0_i32_0 = arith.constant 0 : i32
    return %arg0, %arg1, %c0_i32 : i32, i32, i32
  }
  func.func @transform_1(%arg0: i32, %arg1: i32) -> i32 {
    %c0_i32 = arith.constant 0 : i32
    %c0_i32_0 = arith.constant 0 : i32
    return %c0_i32 : i32
  }
  func.func @transform_2(%arg0: i32, %arg1: i32) -> i32 {
    %c0_i32 = arith.constant 0 : i32
    %c0_i32_0 = arith.constant 0 : i32
    return %c0_i32 : i32
  }
  func.func @transform_3(%arg0: i32, %arg1: i32) -> i32 {
    %c0_i32 = arith.constant 0 : i32
    %c0_i32_0 = arith.constant 0 : i32
    return %c0_i32 : i32
  }
  func.func @transform_4(%arg0: i32, %arg1: i32) -> i32 {
    %c0_i32 = arith.constant 0 : i32
    %c0_i32_0 = arith.constant 0 : i32
    return %c0_i32 : i32
  }
  func.func @transform_5(%arg0: i32, %arg1: i32) -> (i32, i32) {
    %c0_i32 = arith.constant 0 : i32
    %c0_i32_0 = arith.constant 0 : i32
    return %arg0, %c0_i32 : i32, i32
  }
}

</mosaic_0001>

<bundles_post_ra>
// kernel: tpu_custom_call.1
= control target key start
LH: loop header
LB: loop body
LE: loop exit
PB: predicated region body
PF: predicated region fallthrough
CT: control target
= control target key end

     0   :  { %11 = vsyncpa [#allocation6], 0  ;;  %s811_s0 = inlined_call_operand.vmem [shape: f32[8,16,8], index: 0, kind: input, shape index: {}]   ;;  %s812_s1 = inlined_call_operand.vmem [shape: f32[16], index: 1, kind: input, shape index: {}]   ;;  %s813_s2 = inlined_call_operand.vmem [shape: f32[16], index: 2, kind: input, shape index: {}]   ;;  %s814_s3 = inlined_call_operand.vmem [shape: f32[16], index: 3, kind: input, shape index: {}]   ;;  %s815_s4 = inlined_call_operand.<no memory space> [shape: f32[1], index: 4, kind: input, shape index: {}]   ;;  %s816_s5 = inlined_call_operand.hbm [shape: f32[8,8], index: 5, kind: output, shape index: {}]  }
   0x1   :  { %12 = vsyncpa [#allocation8], 0  ;;  %s32_s20 = sshll.u32 %s813_s2, 4  ;;  %s33_s20 = int_to_ptr.vmem [resolvable:$true] %s32_s20 }
   0x2   :  { %13 = vsyncpa [#allocation5], 0  ;;  %s22_s23 = sshll.u32 %s812_s1, 4  ;;  %s477_s24 = scalar_lea.vmem %s33_s20, 16  ;;  %s23_s23 = int_to_ptr.vmem [resolvable:$true] %s22_s23 }
   0x3   :  { %p478_p0 = scmp.ne.s32.totalorder %s33_s20, %s477_s24  ;;  %p482_p1 = scmp.lt.s32.totalorder %s33_s20, %s33_s20 }
   0x4   :  { %p483_p2 = scmp.lt.s32.totalorder %s477_s24, %s477_s24 }
   0x6   :  { %p484_p3 = por %p483_p2, %p482_p1 }
   0x8   :  { %p485_p4 = pnand %p484_p3, %p478_p0 }
   0xa   :  { %488 = shalt.err (!%p485_p4)
}
   0xb   :  { %s541_s25 = smov [#allocation7]   ;;  %s489_s26 = scalar_lea.vmem %s23_s23, 16 }
   0xc   :  { %35 = dma.vmem_to_smem %s33_s20, 16, %s541_s25, [#allocation8]  }
   0xd   :  { %p490_p5 = scmp.ne.s32.totalorder %s23_s23, %s489_s26  ;;  %p494_p6 = scmp.lt.s32.totalorder %s23_s23, %s23_s23 }
   0xe   :  { %p495_p7 = scmp.lt.s32.totalorder %s489_s26, %s489_s26 }
  0x10   :  { %p496_p8 = por %p495_p7, %p494_p6 }
  0x12   :  { %p497_p9 = pnand %p496_p8, %p490_p5 }
  0x14   :  { %500 = shalt.err (!%p497_p9)
}
  0x15   :  { %s542_s2 = smov [#allocation4]   ;;  %s42_s28 = sshll.u32 %s814_s3, 4  ;;  %s43_s28 = int_to_ptr.vmem [resolvable:$true] %s42_s28 }
  0x16   :  { %25 = dma.vmem_to_smem %s23_s23, 16, %s542_s2, [#allocation6]  }
  0x17   :  { %s501_s29 = scalar_lea.vmem %s43_s28, 16  ;;  %p506_p11 = scmp.lt.s32.totalorder %s43_s28, %s43_s28 }
  0x18   :  { %p502_p10 = scmp.ne.s32.totalorder %s43_s28, %s501_s29  ;;  %p507_p12 = scmp.lt.s32.totalorder %s501_s29, %s501_s29 }
  0x1a   :  { %p508_p13 = por %p507_p12, %p506_p11 }
  0x1c   :  { %p509_p0 = pnand %p508_p13, %p502_p10 }
  0x1e   :  { %512 = shalt.err (!%p509_p0)
}
  0x1f   :  { %s543_s30 = smov [#allocation9]  }
  0x20   :  { %45 = dma.vmem_to_smem %s43_s28, 16, %s543_s30, [#allocation8]  }
  0x21   :  { %535 = dma.done.wait [#allocation6], 16  }
  0x22   :  { %536 = vsyncadd [#allocation6], 4294967280 }
  0x23   :  { %537 = dma.done.wait [#allocation8], 32  }
  0x24   :  { %538 = vsyncadd [#allocation8], 4294967264 }
  0x25   :  { %57 = sfence }
  0x26   :  { %vm62_vm0 = vcmask 64512   ;;  %v65_v0 = vld [vmem:[%s811_s0] sm:$0xff]  ;;  %v66_v1 = vld [vmem:[%s811_s0 + $0x8] sm:$0xff]  ;;  %v67_v2 = vld [vmem:[%s811_s0 + $0x10] sm:$0xff]  ;;  %v544_v3 = vmov 0.0   ;;  %vm162_vm1 = vcmask 1041409  }
  0x27   :  { %63 = vst.msk [vmem:[#allocation2] sm:$0xff] %vm62_vm0, %v544_v3  ;;  %v68_v4 = vld [vmem:[%s811_s0 + $0x18] sm:$0xff]  ;;  %v69_v5 = vld [vmem:[%s811_s0 + $0x20] sm:$0xff]  ;;  %v70_v6 = vld [vmem:[%s811_s0 + $0x28] sm:$0xff]  ;;  %v82_v7 = vsel %vm62_vm0, %v65_v0, 0.0  ;;  %v83_v8 = vsel %vm62_vm0, %v66_v1, 0.0 }
  0x28   :  { %v91_v9 = vsel %vm62_vm0, %v67_v2, 0.0  ;;  %v71_v10 = vld [vmem:[%s811_s0 + $0x30] sm:$0xff]  ;;  %v72_v11 = vld [vmem:[%s811_s0 + $0x38] sm:$0xff]  ;;  %v73_v12 = vld [vmem:[%s811_s0 + $0x40] sm:$0xff]  ;;  %v84_v13 = vadd.f32 %v83_v8, %v82_v7  ;;  %v92_v14 = vsel %vm62_vm0, %v68_v4, 0.0  ;;  %v100_v15 = vsel %vm62_vm0, %v69_v5, 0.0 }
  0x29   :  { %v101_v16 = vsel %vm62_vm0, %v70_v6, 0.0  ;;  %v74_v17 = vld [vmem:[%s811_s0 + $0x48] sm:$0xff]  ;;  %v75_v18 = vld [vmem:[%s811_s0 + $0x50] sm:$0xff]  ;;  %v76_v19 = vld [vmem:[%s811_s0 + $0x58] sm:$0xff]  ;;  %v93_v20 = vadd.f32 %v92_v14, %v91_v9  ;;  %v109_v22 = vsel %vm62_vm0, %v71_v10, 0.0  ;;  %v110_v23 = vsel %vm62_vm0, %v72_v11, 0.0 }
  0x2a   :  { %v102_v21 = vadd.f32 %v101_v16, %v100_v15  ;;  %v77_v24 = vld [vmem:[%s811_s0 + $0x60] sm:$0xff]  ;;  %v85_v25 = vrot.slane %v84_v13, 4  ;;  %v111_v26 = vadd.f32 %v110_v23, %v109_v22  ;;  %v118_v27 = vsel %vm62_vm0, %v73_v12, 0.0  ;;  %v78_v29 = vld [vmem:[%s811_s0 + $0x68] sm:$0xff]  ;;  %v79_v30 = vld [vmem:[%s811_s0 + $0x70] sm:$0xff]  ;;  %s653_s9 = sld [smem:[#allocation7]] }
  0x2b   :  { %v119_v28 = vsel %vm62_vm0, %v74_v17, 0.0  ;;  %v94_v31 = vrot.slane %v93_v20, 4  ;;  %v127_v34 = vsel %vm62_vm0, %v75_v18, 0.0  ;;  %v128_v37 = vsel %vm62_vm0, %v76_v19, 0.0  ;;  %v80_v39 = vld [vmem:[%s811_s0 + $0x78] sm:$0xff]  ;;  %s651_s0 = sld [smem:[#allocation4]] }
  0x2c   :  { %v103_v32 = vrot.slane %v102_v21, 4  ;;  %v120_v33 = vadd.f32 %v119_v28, %v118_v27  ;;  %v86_v35 = vadd.f32 %v85_v25, %v84_v13  ;;  %v112_v36 = vrot.slane %v111_v26, 4  ;;  %s655_s10 = sld [smem:[#allocation4 + $0x1]]  ;;  %s395_s12 = sld [smem:[#allocation4 + $0x2]] }
  0x2d   :  { %v136_v38 = vsel %vm62_vm0, %v77_v24, 0.0  ;;  %v95_v40 = vadd.f32 %v94_v31, %v93_v20  ;;  %v129_v43 = vadd.f32 %v128_v37, %v127_v34  ;;  %v137_v46 = vsel %vm62_vm0, %v78_v29, 0.0  ;;  %s657_s11 = sld [smem:[#allocation7 + $0x1]]  ;;  %s659_s13 = sld [smem:[#allocation7 + $0x2]] }
  0x2e   :  { %v104_v41 = vadd.f32 %v103_v32, %v102_v21  ;;  %v121_v42 = vrot.slane %v120_v33, 4  ;;  %v87_v44 = vrot.slane %v86_v35, 2  ;;  %v113_v45 = vadd.f32 %v112_v36, %v111_v26  ;;  %v64_v29 = vld [vmem:[#allocation2] sm:$0xff]  ;;  %s398_s14 = sld [smem:[#allocation4 + $0x3]]  ;;  %s401_s15 = sld [smem:[#allocation4 + $0x4]] }
  0x2f   :  { %v145_v47 = vsel %vm62_vm0, %v79_v30, 0.0  ;;  %v96_v48 = vrot.slane %v95_v40, 2  ;;  %v130_v51 = vrot.slane %v129_v43, 4  ;;  %v138_v54 = vadd.f32 %v137_v46, %v136_v38  ;;  %s662_s16 = sld [smem:[#allocation4 + $0x5]]  ;;  %s664_s17 = sld [smem:[#allocation7 + $0x3]] }
  0x30   :  { %v105_v49 = vrot.slane %v104_v41, 2  ;;  %v122_v50 = vadd.f32 %v121_v42, %v120_v33  ;;  %v88_v52 = vadd.f32 %v87_v44, %v86_v35  ;;  %v114_v53 = vrot.slane %v113_v45, 2  ;;  %s666_s18 = sld [smem:[#allocation4 + $0x6]]  ;;  %s668_s19 = sld [smem:[#allocation7 + $0x4]] }
  0x31   :  { %v146_v55 = vsel %vm62_vm0, %v80_v39, 0.0  ;;  %v97_v56 = vadd.f32 %v96_v48, %v95_v40  ;;  %v131_v59 = vadd.f32 %v130_v51, %v129_v43  ;;  %v139_v62 = vrot.slane %v138_v54, 4  ;;  %s670_s20 = sld [smem:[#allocation7 + $0x5]]  ;;  %s672_s21 = sld [smem:[#allocation4 + $0x7]] }
  0x32   :  { %v106_v57 = vadd.f32 %v105_v49, %v104_v41  ;;  %v123_v58 = vrot.slane %v122_v50, 2  ;;  %v89_v60 = vrot.slane %v88_v52, 1  ;;  %v115_v61 = vadd.f32 %v114_v53, %v113_v45  ;;  %s674_s22 = sld [smem:[#allocation7 + $0x6]]  ;;  %s676_s23 = sld [smem:[#allocation4 + $0x8]] }
  0x33   :  { %v147_v63 = vadd.f32 %v146_v55, %v145_v47  ;;  %v98_v0 = vrot.slane %v97_v56, 1  ;;  %v132_v3 = vrot.slane %v131_v59, 2  ;;  %v140_v6 = vadd.f32 %v139_v62, %v138_v54  ;;  %s684_s24 = sld [smem:[#allocation7 + $0x7]]  ;;  %s686_s25 = sld [smem:[#allocation4 + $0x9]] }
  0x34   :  { %v107_v1 = vrot.slane %v106_v57, 1  ;;  %v124_v2 = vadd.f32 %v123_v58, %v122_v50  ;;  %v90_v4 = vadd.f32 %v89_v60, %v88_v52  ;;  %v116_v5 = vrot.slane %v115_v61, 1  ;;  %s696_s26 = sld [smem:[#allocation7 + $0x8]]  ;;  %s698_s2 = sld [smem:[#allocation4 + $0xa]] }
  0x35   :  { %v148_v7 = vrot.slane %v147_v63, 4  ;;  %v99_v8 = vadd.f32 %v98_v0, %v97_v56  ;;  %v133_v11 = vadd.f32 %v132_v3, %v131_v59  ;;  %v141_v13 = vrot.slane %v140_v6, 2  ;;  %s705_s1 = sld [smem:[#allocation7 + $0x9]]  ;;  %s707_s27 = sld [smem:[#allocation4 + $0xb]] }
  0x36   :  { %v108_v9 = vadd.f32 %v107_v1, %v106_v57  ;;  %v125_v10 = vrot.slane %v124_v2, 1  ;;  %v117_v12 = vadd.f32 %v116_v5, %v115_v61  ;;  %vm164_vm2 = vcmask 1042434   ;;  %s709_s28 = sld [smem:[#allocation9]]  ;;  %s711_s29 = sld [smem:[#allocation9 + $0x1]] }
  0x37   :  { %v149_v14 = vadd.f32 %v148_v7, %v147_v63  ;;  %v134_v16 = vrot.slane %v133_v11, 1  ;;  %v163_v17 = vsel %vm162_vm1, %v99_v8, %v90_v4  ;;  %vm166_vm3 = vcmask 1043459   ;;  %s716_s30 = sld [smem:[#allocation7 + $0xa]]  ;;  %s718_s6 = sld [smem:[#allocation4 + $0xc]] }
  0x38   :  { %v126_v15 = vadd.f32 %v125_v10, %v124_v2  ;;  %v142_v18 = vadd.f32 %v141_v13, %v140_v6  ;;  %v165_v20 = vsel %vm164_vm2, %v108_v9, %v163_v17  ;;  %vm168_vm4 = vcmask 1044484   ;;  %s720_s7 = sld [smem:[#allocation9 + $0x2]]  ;;  %s722_s3 = sld [smem:[#allocation9 + $0x3]] }
  0x39   :  { %v150_v19 = vrot.slane %v149_v14, 2  ;;  %v135_v21 = vadd.f32 %v134_v16, %v133_v11  ;;  %v167_v22 = vsel %vm166_vm3, %v117_v12, %v165_v20  ;;  %vm170_vm5 = vcmask 1045509   ;;  %s727_s8 = sld [smem:[#allocation7 + $0xb]] }
  0x3a   :  { %v143_v23 = vrot.slane %v142_v18, 1  ;;  %v169_v25 = vsel %vm168_vm4, %v126_v15, %v167_v22  ;;  %vm172_vm6 = vcmask 1046534   ;;  %vm174_vm7 = vcmask 1047559  }
  0x3b   :  { %v151_v24 = vadd.f32 %v150_v19, %v149_v14  ;;  %v171_v26 = vsel %vm170_vm5, %v135_v21, %v169_v25  ;;  %v186_v35 = vstv %s651_s0  ;;  %v197_v36 = vstv %s655_s10  ;;  %s729_s0 = sld [smem:[#allocation4 + $0xd]]  ;;  %s736_s10 = sld [smem:[#allocation7 + $0xc]] }
  0x3c   :  { %v144_v27 = vadd.f32 %v143_v23, %v142_v18  ;;  %v208_v37 = vstv %s395_s12  ;;  %v219_v38 = vstv %s398_s14  ;;  %v189_v40 = vstv %s653_s9  ;;  %s731_s9 = sld [smem:[#allocation9 + $0x4]]  ;;  %s743_s12 = sld [smem:[#allocation7 + $0xd]] }
  0x3d   :  { %v152_v28 = vrot.slane %v151_v24, 1  ;;  %v230_v41 = vstv %s401_s15  ;;  %v241_v42 = vstv %s662_s16  ;;  %v200_v43 = vstv %s657_s11  ;;  %s738_s11 = sld [smem:[#allocation4 + $0xe]]  ;;  %s747_s14 = sld [smem:[#allocation9 + $0x5]] }
  0x3e   :  { %v173_v31 = vsel %vm172_vm6, %v144_v27, %v171_v26  ;;  %v211_v44 = vstv %s659_s13  ;;  %v222_v45 = vstv %s664_s17  ;;  %v252_v46 = vstv %s666_s18  ;;  %s745_s13 = sld [smem:[#allocation4 + $0xf]]  ;;  %s753_s15 = sld [smem:[#allocation7 + $0xe]] }
  0x3f   :  { %v153_v30 = vadd.f32 %v152_v28, %v151_v24  ;;  %v233_v52 = vstv %s668_s19  ;;  %v244_v54 = vstv %s670_s20  ;;  %v263_v58 = vstv %s672_s21  ;;  %s756_s16 = sld [smem:[#allocation9 + $0x6]]  ;;  %s763_s17 = sld [smem:[#allocation7 + $0xf]] }
  0x40   :  { %v255_v62 = vstv %s674_s22  ;;  %v274_v63 = vstv %s676_s23  ;;  %v266_v2 = vstv %s684_s24  ;;  %v285_v3 = vstv %s686_s25  ;;  %s765_s18 = sld [smem:[#allocation9 + $0x7]]  ;;  %s771_s19 = sld [smem:[#allocation9 + $0x8]] }
  0x41   :  { %v175_v32 = vsel %vm174_vm7, %v153_v30, %v173_v31  ;;  %v277_v6 = vstv %s696_s26  ;;  %v296_v7 = vstv %s698_s2  ;;  %v288_v10 = vstv %s705_s1  ;;  %s777_s20 = sld [smem:[#allocation9 + $0x9]]  ;;  %s782_s21 = sld [smem:[#allocation9 + $0xa]] }
  0x42   :  { %v177_v33 = vadd.f32 %v175_v32, %v64_v29  ;;  %v307_v11 = vstv %s707_s27  ;;  %v192_v14 = vstv %s709_s28  ;;  %v299_v15 = vstv %s716_s30  ;;  %s787_s22 = sld [smem:[#allocation9 + $0xb]]  ;;  %s424_s23 = sld [smem:[#allocation9 + $0xc]] }
  0x43   :  { %v318_v16 = vstv %s718_s6  ;;  %v203_v17 = vstv %s711_s29  ;;  %v214_v21 = vstv %s720_s7  ;;  %v225_v22 = vstv %s722_s3  ;;  %s427_s24 = sld [smem:[#allocation9 + $0xd]]  ;;  %s430_s25 = sld [smem:[#allocation9 + $0xe]] }
  0x44   :  { %178 = vst.msk [vmem:[#allocation2] sm:$0xff] %vm62_vm0, %v177_v33  ;;  %v310_v23 = vstv %s727_s8  ;;  %v329_v24 = vstv %s729_s0  ;;  %v236_v31 = vstv %s731_s9  ;;  %v321_v32 = vstv %s736_s10  ;;  %s433_s26 = sld [smem:[#allocation9 + $0xf]]  ;;  %s545_s27 = smov [#allocation10]  }
  0x45   :  { %v340_v33 = vstv %s738_s11  ;;  %s381_s28 = sshll.u32 %s545_s27, 4  ;;  %s382_s28 = int_to_ptr.vmem [resolvable:$true] %s381_s28 }
  0x46   :  { %p518_p2 = scmp.lt.s32.totalorder %s382_s28, %s382_s28 }
  0x4b   :  { %v182_v34 = vld [vmem:[#allocation2] sm:$0xff] }
  0x4c   :  { %v680_v39 = vmul.f32 0.0625, %v182_v34 }
  0x4e   :  { %v187_v47 = vmul.f32 %v186_v35, %v680_v39  ;;  %v198_v48 = vmul.f32 %v197_v36, %v680_v39  ;;  %v209_v49 = vmul.f32 %v208_v37, %v680_v39  ;;  %v220_v50 = vmul.f32 %v219_v38, %v680_v39 }
  0x4f   :  { %v231_v51 = vmul.f32 %v230_v41, %v680_v39  ;;  %v242_v53 = vmul.f32 %v241_v42, %v680_v39  ;;  %v253_v60 = vmul.f32 %v252_v46, %v680_v39  ;;  %v264_v1 = vmul.f32 %v263_v58, %v680_v39 }
  0x50   :  { %v190_v55 = vadd.f32 %v189_v40, %v187_v47  ;;  %v201_v56 = vadd.f32 %v200_v43, %v198_v48  ;;  %v212_v57 = vadd.f32 %v211_v44, %v209_v49  ;;  %v223_v59 = vadd.f32 %v222_v45, %v220_v50 }
  0x51   :  { %v234_v61 = vadd.f32 %v233_v52, %v231_v51  ;;  %v245_v0 = vadd.f32 %v244_v54, %v242_v53  ;;  %v256_v4 = vadd.f32 %v255_v62, %v253_v60  ;;  %v275_v5 = vmul.f32 %v274_v63, %v680_v39 }
  0x52   :  { %441 = vtanh.f32 %v190_v55  ;;  %v267_v8 = vadd.f32 %v266_v2, %v264_v1  ;;  %v286_v9 = vmul.f32 %v285_v3, %v680_v39  ;;  %v297_v13 = vmul.f32 %v296_v7, %v680_v39 }
  0x53   :  { %443 = vtanh.f32 %v201_v56  ;;  %v278_v12 = vadd.f32 %v277_v6, %v275_v5  ;;  %v308_v19 = vmul.f32 %v307_v11, %v680_v39  ;;  %v319_v28 = vmul.f32 %v318_v16, %v680_v39 }
  0x54   :  { %445 = vtanh.f32 %v212_v57  ;;  %v289_v18 = vadd.f32 %v288_v10, %v286_v9  ;;  %v300_v27 = vadd.f32 %v299_v15, %v297_v13  ;;  %v330_v37 = vmul.f32 %v329_v24, %v680_v39 }
  0x55   :  { %447 = vtanh.f32 %v223_v59  ;;  %v311_v36 = vadd.f32 %v310_v23, %v308_v19  ;;  %v332_v42 = vstv %s743_s12  ;;  %v351_v43 = vstv %s745_s13 }
  0x56   :  { %449 = vtanh.f32 %v234_v61  ;;  %v247_v45 = vstv %s747_s14  ;;  %v322_v46 = vadd.f32 %v321_v32, %v319_v28  ;;  %v341_v47 = vmul.f32 %v340_v33, %v680_v39 }
  0x57   :  { %451 = vtanh.f32 %v245_v0  ;;  %v343_v50 = vstv %s753_s15  ;;  %v258_v52 = vstv %s756_s16  ;;  %v333_v53 = vadd.f32 %v332_v42, %v330_v37 }
  0x58   :  { %453 = vtanh.f32 %v256_v4  ;;  %v352_v54 = vmul.f32 %v351_v43, %v680_v39  ;;  %v354_v57 = vstv %s763_s17  ;;  %v269_v59 = vstv %s765_s18 }
  0x59   :  { %455 = vtanh.f32 %v267_v8  ;;  %v344_v60 = vadd.f32 %v343_v50, %v341_v47  ;;  %v280_v0 = vstv %s771_s19  ;;  %v291_v4 = vstv %s777_s20 }
  0x5a   :  { %457 = vtanh.f32 %v278_v12  ;;  %v355_v1 = vadd.f32 %v354_v57, %v352_v54  ;;  %v302_v8 = vstv %s782_s21  ;;  %v313_v12 = vstv %s787_s22 }
  0x5b   :  { %459 = vtanh.f32 %v289_v18  ;;  %v324_v16 = vstv %s424_s23  ;;  %v346_v24 = vstv %s430_s25  ;;  %v357_v28 = vstv %s433_s26 }
  0x5c   :  { %v442_v20 = vpop.eup %441  ;;  %461 = vtanh.f32 %v300_v27 }
  0x5d   :  { %v444_v25 = vpop.eup %443  ;;  %v193_v26 = vmul.f32 %v442_v20, %v192_v14  ;;  %463 = vtanh.f32 %v311_v36  ;;  %v335_v20 = vstv %s427_s24 }
  0x5e   :  { %v446_v29 = vpop.eup %445  ;;  %v204_v30 = vmul.f32 %v444_v25, %v203_v17  ;;  %465 = vtanh.f32 %v322_v46 }
  0x5f   :  { %v448_v34 = vpop.eup %447  ;;  %v215_v35 = vmul.f32 %v446_v29, %v214_v21  ;;  %467 = vtanh.f32 %v333_v53 }
  0x60   :  { %v450_v38 = vpop.eup %449  ;;  %v205_v40 = vadd.f32 %v204_v30, %v193_v26  ;;  %v226_v41 = vmul.f32 %v448_v34, %v225_v22  ;;  %469 = vtanh.f32 %v344_v60  ;;  %v361_v34 = vstv %s815_s4  ;;  %s513_s4 = scalar_lea.vmem %s382_s28, 128 }
  0x61   :  { %v452_v44 = vpop.eup %451  ;;  %v237_v49 = vmul.f32 %v450_v38, %v236_v31  ;;  %471 = vtanh.f32 %v355_v1  ;;  %p514_p1 = scmp.ne.s32.totalorder %s382_s28, %s513_s4  ;;  %p519_p3 = scmp.lt.s32.totalorder %s513_s4, %s513_s4 }
  0x62   :  { %v216_v48 = vadd.f32 %v215_v35, %v205_v40  ;;  %v454_v51 = vpop.eup %453  ;;  %v248_v56 = vmul.f32 %v452_v44, %v247_v45 }
  0x63   :  { %v456_v58 = vpop.eup %455  ;;  %v259_v62 = vmul.f32 %v454_v51, %v258_v52  ;;  %p520_p4 = por %p519_p3, %p518_p2 }
  0x64   :  { %v227_v55 = vadd.f32 %v226_v41, %v216_v48  ;;  %v458_v63 = vpop.eup %457  ;;  %v270_v2 = vmul.f32 %v456_v58, %v269_v59 }
  0x65   :  { %v460_v3 = vpop.eup %459  ;;  %v281_v6 = vmul.f32 %v458_v63, %v280_v0  ;;  %p521_p5 = pnand %p520_p4, %p514_p1 }
  0x66   :  { %v238_v61 = vadd.f32 %v237_v49, %v227_v55  ;;  %v462_v7 = vpop.eup %461  ;;  %v292_v10 = vmul.f32 %v460_v3, %v291_v4 }
  0x67   :  { %v464_v11 = vpop.eup %463  ;;  %v303_v14 = vmul.f32 %v462_v7, %v302_v8 }
  0x68   :  { %v249_v39 = vadd.f32 %v248_v56, %v238_v61  ;;  %v466_v15 = vpop.eup %465  ;;  %v314_v18 = vmul.f32 %v464_v11, %v313_v12 }
  0x69   :  { %v468_v19 = vpop.eup %467  ;;  %v325_v22 = vmul.f32 %v466_v15, %v324_v16 }
  0x6a   :  { %v260_v5 = vadd.f32 %v259_v62, %v249_v39  ;;  %v470_v23 = vpop.eup %469  ;;  %v336_v26 = vmul.f32 %v468_v19, %v335_v20 }
  0x6b   :  { %v472_v27 = vpop.eup %471  ;;  %v347_v30 = vmul.f32 %v470_v23, %v346_v24 }
  0x6c   :  { %v271_v9 = vadd.f32 %v270_v2, %v260_v5  ;;  %v358_v32 = vmul.f32 %v472_v27, %v357_v28 }
  0x6e   :  { %v282_v13 = vadd.f32 %v281_v6, %v271_v9 }
  0x70   :  { %v293_v17 = vadd.f32 %v292_v10, %v282_v13 }
  0x72   :  { %v304_v21 = vadd.f32 %v303_v14, %v293_v17 }
  0x74   :  { %v315_v25 = vadd.f32 %v314_v18, %v304_v21 }
  0x76   :  { %v326_v29 = vadd.f32 %v325_v22, %v315_v25 }
  0x78   :  { %v337_v31 = vadd.f32 %v336_v26, %v326_v29 }
  0x7a   :  { %v348_v33 = vadd.f32 %v347_v30, %v337_v31 }
  0x7c   :  { %v359_v35 = vadd.f32 %v358_v32, %v348_v33 }
  0x7e   :  { %v362_v36 = vadd.f32 %v361_v34, %v359_v35 }
  0x80   :  { %v363_v37 = vsel %vm62_vm0, %v362_v36, -inf }
  0x81   :  { %364 = vmax.xlane.f32.xlu0 %v363_v37 }
 0x10e   :  { %v365_v38 = vpop.xlane.xlu0 %364 }
 0x10f   :  { %v366_v40 = vsub.f32 %v362_v36, %v365_v38 }
 0x111   :  { %v367_v41 = vmul.f32 1.442695, %v366_v40 }
 0x113   :  { %473 = vpow2.f32 %v367_v41 }
 0x11d   :  { %v474_v42 = vpop.eup %473 }
 0x11e   :  { %v369_v43 = vsel %vm62_vm0, %v474_v42, 0.0 }
 0x11f   :  { %370 = vadd.xlane.f32.xlu0 %v369_v43 }
 0x1ac   :  { %v371_v44 = vpop.xlane.xlu0 %370 }
 0x1ad   :  { %475 = vrcp.f32 %v371_v44 }
 0x1b7   :  { %v476_v45 = vpop.eup %475 }
 0x1b8   :  { %v373_v46 = vmul.f32 %v476_v45, %v474_v42 }
 0x1ba   :  { %374 = vst.msk [vmem:[#allocation10] sm:$0xff] %vm62_vm0, %v373_v46 }
 0x1bb   :  { %524 = shalt.err (!%p521_p5)
}
 0x1bc   :  { %s525_s6 = scalar_lea.hbm %s816_s5, 128 }
 0x1bd   :  { %p526_p6 = scmp.ne.s32.totalorder %s816_s5, %s525_s6  ;;  %p529_p7 = scmp.lt.u32.totalorder %s525_s6, %s816_s5 }
 0x1bf   :  { %p531_p8 = pnand %p529_p7, %p526_p6 }
 0x1c1   :  { %534 = shalt.err (!%p531_p8)
}
 0x1c2   :  { %384 = dma.vmem_to_hbm [thread:$0]  %s382_s28, 128, %s816_s5, [#allocation5]  }
 0x1c3   :  { %539 = dma.done.wait [#allocation5], 128  }
 0x1c4   :  { %540 = vsyncadd [#allocation5], 4294967168 }
 0x1c5   :  { %388 = vsyncpa [#allocation5], 1 }
 0x1c6   :  { %389 = vsyncpa [#allocation6], 1 }
 0x1c7   :  { %390 = vsyncpa [#allocation8], 1 }

</bundles_post_ra>
